<compile_context>
chip_gen: v5e
topology: v5e:2x2
jax: 0.10.0
libtpu: 0.0.40
codegen_flags: <defaults>
</compile_context>

<pallas_src>
import functools

import jax
import jax.numpy as jnp
from jax import lax
from jax.experimental import pallas as pl
from jax.experimental.pallas import tpu as pltpu

_LANES = 128
_CHUNK = 32   # rows folded per inner step; multiple of every sublane packing (f32:8, bf16:16, int8:32)


def _round_up(x, m):
    return ((x + m - 1) // m) * m


def _cdiv(a, b):
    return -(-a // b)


def _masked_mse_kernel(pred_ref, target_ref, mask_ref, out_ref, acc_ref, *,
                       blocks_per_core, valid_rows):
    block_rows = pred_ref.shape[0]          # static
    c = pl.program_id(0)                    # "parallel" axis (one value per TC on v7x)
    j = pl.program_id(1)                    # "arbitrary" accumulation axis

    @pl.when(j == 0)
    def _init():
        acc_ref[...] = jnp.zeros_like(acc_ref)

    # Intended (unclamped) start row of this block.  Phantom blocks (their DMA
    # index is clamped onto the last real block by the index_map) and the
    # out-of-bounds tail of a partial boundary block both have row indices
    # >= valid_rows and are masked to exactly zero below.
    start_row = (c * blocks_per_core + j) * block_rows
    row_local = lax.broadcasted_iota(jnp.int32, (_CHUNK, _LANES), 0)

    @pl.loop(0, block_rows // _CHUNK)
    def _fold(ci):
        off = ci * _CHUNK
        base = pl.multiple_of(off, _CHUNK)
        p = pred_ref[pl.ds(base, _CHUNK), :].astype(jnp.float32)
        t = target_ref[pl.ds(base, _CHUNK), :].astype(jnp.float32)
        m = mask_ref[pl.ds(base, _CHUNK), :].astype(jnp.float32)
        valid = (row_local + (start_row + off)) < valid_rows
        d = p * m - t                        # MSELoss(pred*mask, target), reduction='sum'
        acc_ref[0] += jnp.where(valid, d * d, 0.0)   # partial sum of squared errors
        acc_ref[1] += jnp.where(valid, m, 0.0)       # partial sum of mask

    @pl.when(j == pl.num_programs(1) - 1)
    def _finalize():
        out_ref[0] = acc_ref[...]            # (2, _CHUNK, 128) partials for this core


def masked_mse_loss(pred, target, mask, *, block_rows=None):
    """pred/target/mask: arrays of identical shape (e.g. [batch, seq_len]).
    Returns scalar f32: sum((pred*mask - target)**2) / sum(mask)."""
    pred = jnp.asarray(pred).reshape(-1)
    target = jnp.asarray(target).reshape(-1)
    mask = jnp.asarray(mask).reshape(-1)
    n = pred.shape[0]
    assert target.shape[0] == n and mask.shape[0] == n

    rows = max(1, _round_up(n, _LANES) // _LANES)        # ceil(n / 128)

    max_itemsize = max(a.dtype.itemsize for a in (pred, target, mask))
    if block_rows is None:
        # ~1 MiB per (largest-dtype) input tile: 2048 rows f32 / 4096 rows bf16.
        block_rows = max(_CHUNK, ((1 << 20) // (_LANES * max_itemsize)) // _CHUNK * _CHUNK)
        block_rows = min(block_rows, _round_up(rows, _CHUNK))
    block_rows = max(_CHUNK, _round_up(block_rows, _CHUNK))

    # Single-tile inputs (tiny) get padded out to one full block (negligible
    # copy, no OOB reads at all).  Multi-tile inputs are only padded to the
    # next lane multiple (<=127 zeros); if n is already a multiple of 128 the
    # reshape is free and there is NO extra HBM pass over the inputs.
    total_rows = block_rows if rows <= block_rows else rows
    n_target = total_rows * _LANES

    def _slab(x):
        if n_target != n:
            # TODO(synk): for large lane-misaligned n this still materialises one
            # padded copy; aligned inputs (the common case) are zero-copy.
            x = jnp.concatenate([x, jnp.zeros((n_target - n,), x.dtype)])
        return x.reshape(total_rows, _LANES)

    pred2d, target2d, mask2d = _slab(pred), _slab(target), _slab(mask)

    total_blocks = _cdiv(total_rows, block_rows)
    blocks_per_core = _cdiv(total_blocks, 2)     # leading "parallel" axis (2 TCs on v7x)
    last_block = total_blocks - 1

    def in_map(c, j):
        # Clamp phantom blocks (odd total_blocks) onto the last real block; the
        # kernel masks their contribution to exactly zero.
        return (jnp.minimum(c * blocks_per_core + j, last_block), 0)

    spec = pl.BlockSpec((block_rows, _LANES), in_map)

    kernel = functools.partial(_masked_mse_kernel,
                               blocks_per_core=blocks_per_core,
                               valid_rows=rows)

    itemsizes = [a.dtype.itemsize for a in (pred2d, target2d, mask2d)]
    tile_bytes = sum(block_rows * _LANES * s for s in itemsizes)
    out_bytes = 2 * 2 * _CHUNK * _LANES * 4
    scratch_bytes = 2 * _CHUNK * _LANES * 4
    vmem_bytes = 2 * tile_bytes + 2 * out_bytes + scratch_bytes + (4 << 20)
    vmem_bytes = int(min(max(vmem_bytes, 4 << 20), 32 << 20))   # safe on v5e/v6e/v7x (v7x: 64 MiB physical)

    bytes_accessed = sum(total_rows * _LANES * s for s in itemsizes) + 2 * out_bytes
    cost = pl.CostEstimate(flops=5 * total_rows * _LANES, transcendentals=0,
                           bytes_accessed=bytes_accessed)

    partials = pl.pallas_call(
        kernel,
        out_shape=jax.ShapeDtypeStruct((2, 2, _CHUNK, _LANES), jnp.float32),
        grid=(2, blocks_per_core),
        in_specs=[spec, spec, spec],
        out_specs=pl.BlockSpec((1, 2, _CHUNK, _LANES), lambda c, j: (c, 0, 0, 0)),
        scratch_shapes=[pltpu.VMEM((2, _CHUNK, _LANES), jnp.float32)],
        compiler_params=pltpu.CompilerParams(
            dimension_semantics=("parallel", "arbitrary"),
            vmem_limit_bytes=vmem_bytes),
        cost_estimate=cost,
    )(pred2d, target2d, mask2d)

    num = jnp.sum(partials[:, 0])
    den = jnp.sum(partials[:, 1])
    return num / den


if __name__ == "__main__":
    key = jax.random.PRNGKey(0)
    k1, k2, k3 = jax.random.split(key, 3)

    # small shapes consistent with the module: pred/target/mask -> batch*seq_len
    batch, seq_len = 2, 8
    pred = jax.random.normal(k1, (batch, seq_len), dtype=jnp.float32)
    target = jax.random.normal(k2, (batch, seq_len), dtype=jnp.float32)
    mask = jax.random.bernoulli(k3, 0.7, (batch, seq_len)).astype(jnp.float32)
    mask = mask.at[0, 0].set(1.0)   # guarantee sum(mask) > 0

    loss = jax.block_until_ready(masked_mse_loss(pred, target, mask))
    ref = jnp.sum((pred * mask - target) ** 2) / jnp.sum(mask)
    assert jnp.allclose(loss, ref, rtol=1e-5, atol=1e-6), (float(loss), float(ref))

    # Larger, deliberately awkward case: exercises lane padding (n % 128 != 0),
    # a partial boundary row-block and the phantom-block clamp on the 2-way
    # parallel split (total_blocks = 3 with block_rows = 32).
    k4, k5, k6 = jax.random.split(jax.random.PRNGKey(1), 3)
    shape2 = (70, 173)
    p2 = jax.random.normal(k4, shape2, dtype=jnp.float32)
    t2 = jax.random.normal(k5, shape2, dtype=jnp.float32)
    m2 = jax.random.bernoulli(k6, 0.5, shape2).astype(jnp.float32)
    m2 = m2.at[0, 0].set(1.0)
    loss2 = jax.block_until_ready(masked_mse_loss(p2, t2, m2, block_rows=32))
    ref2 = jnp.sum((p2 * m2 - t2) ** 2) / jnp.sum(m2)
    assert jnp.allclose(loss2, ref2, rtol=1e-4, atol=1e-5), (float(loss2), float(ref2))

    print("KERNEL_OK")
</pallas_src>

<mosaic_0001>
module attributes {stable_mosaic.version = 11 : i64} {
  func.func @_masked_mse_kernel(%arg0: i32, %arg1: i32, %arg2: memref<32x128xf32, #tpu.memory_space<vmem>>, %arg3: memref<32x128xf32, #tpu.memory_space<vmem>>, %arg4: memref<32x128xf32, #tpu.memory_space<vmem>>, %arg5: memref<1x2x32x128xf32, #tpu.memory_space<vmem>>, %arg6: memref<2x32x128xf32, #tpu.memory_space<vmem>>) attributes {dimension_semantics = [#tpu.dimension_semantics<parallel>, #tpu.dimension_semantics<arbitrary>], iteration_bounds = array<i64: 2, 1>, scalar_prefetch = 0 : i64, scratch_operands = 1 : i64, tpu.core_type = #tpu.core_type<tc>, window_params = [{transform_indices = @transform_0, window_bounds = array<i64: 32, 128>}, {transform_indices = @transform_1, window_bounds = array<i64: 32, 128>}, {transform_indices = @transform_2, window_bounds = array<i64: 32, 128>}, {transform_indices = @transform_3, window_bounds = array<i64: 1, 2, 32, 128>}]} {
    %c0_i32 = arith.constant 0 : i32
    %0 = arith.cmpi eq, %arg1, %c0_i32 : i32
    %1 = arith.extui %0 : i1 to i32
    %c0_i32_0 = arith.constant 0 : i32
    %2 = arith.cmpi ne, %1, %c0_i32_0 : i32
    scf.if %2 {
      %cst_23 = arith.constant 0.000000e+00 : f32
      %44 = vector.broadcast %cst_23 : f32 to vector<2x32x128xf32>
      %c0_24 = arith.constant 0 : index
      %c0_25 = arith.constant 0 : index
      %c0_26 = arith.constant 0 : index
      %45 = vector.load %arg6[%c0_24, %c0_25, %c0_26] : memref<2x32x128xf32, #tpu.memory_space<vmem>>, vector<2x32x128xf32>
      tpu.vector_store %arg6[%c0_24, %c0_25, %c0_26], %44 {strides = array<i32>} : memref<2x32x128xf32, #tpu.memory_space<vmem>>, vector<2x32x128xf32>,
    } else {
    }
    %c1_i32 = arith.constant 1 : i32
    %3 = arith.muli %arg0, %c1_i32 : i32
    %4 = arith.addi %3, %arg1 : i32
    %c32_i32 = arith.constant 32 : i32
    %5 = arith.muli %4, %c32_i32 : i32
    %6 = tpu.iota {dimensions = array<i32: 0>} : vector<32x128xi32>
    %c0_i32_1 = arith.constant 0 : i32
    %c1_i32_2 = arith.constant 1 : i32
    %7 = arith.muli %c0_i32_1, %c1_i32_2 : i32
    %c0_i32_3 = arith.constant 0 : i32
    %8 = arith.addi %c0_i32_3, %7 : i32
    %c32_i32_4 = arith.constant 32 : i32
    %9 = arith.muli %8, %c32_i32_4 : i32
    %10 = tpu.assume_multiple %9, 32 : i32
    %11 = arith.index_cast %10 : i32 to index
    %c0 = arith.constant 0 : index
    %12 = vector.load %arg2[%11, %c0] : memref<32x128xf32, #tpu.memory_space<vmem>>, vector<32x128xf32>
    %13 = arith.index_cast %10 : i32 to index
    %c0_5 = arith.constant 0 : index
    %14 = vector.load %arg3[%13, %c0_5] : memref<32x128xf32, #tpu.memory_space<vmem>>, vector<32x128xf32>
    %15 = arith.index_cast %10 : i32 to index
    %c0_6 = arith.constant 0 : index
    %16 = vector.load %arg4[%15, %c0_6] : memref<32x128xf32, #tpu.memory_space<vmem>>, vector<32x128xf32>
    %17 = arith.addi %5, %9 : i32
    %18 = vector.broadcast %17 : i32 to vector<32x128xi32>
    %19 = arith.addi %6, %18 : vector<32x128xi32>
    %c1_i32_7 = arith.constant 1 : i32
    %20 = vector.broadcast %c1_i32_7 : i32 to vector<32x128xi32>
    %21 = arith.cmpi slt, %19, %20 : vector<32x128xi32>
    %22 = arith.mulf %12, %16 : vector<32x128xf32>
    %23 = arith.subf %22, %14 : vector<32x128xf32>
    %c0_8 = arith.constant 0 : index
    %c0_9 = arith.constant 0 : index
    %c0_10 = arith.constant 0 : index
    %24 = vector.load %arg6[%c0_8, %c0_9, %c0_10] : memref<2x32x128xf32, #tpu.memory_space<vmem>>, vector<1x32x128xf32>
    %25 = vector.shape_cast %24 : vector<1x32x128xf32> to vector<32x128xf32>
    %26 = arith.mulf %23, %23 : vector<32x128xf32>
    %cst = arith.constant 0.000000e+00 : f32
    %27 = vector.broadcast %cst : f32 to vector<32x128xf32>
    %28 = arith.select %21, %26, %27 : vector<32x128xi1>, vector<32x128xf32>
    %29 = arith.addf %25, %28 : vector<32x128xf32>
    %c0_11 = arith.constant 0 : index
    %c0_12 = arith.constant 0 : index
    %c0_13 = arith.constant 0 : index
    %30 = vector.load %arg6[%c0_11, %c0_12, %c0_13] : memref<2x32x128xf32, #tpu.memory_space<vmem>>, vector<1x32x128xf32>
    %31 = vector.shape_cast %30 : vector<1x32x128xf32> to vector<32x128xf32>
    %32 = vector.shape_cast %29 : vector<32x128xf32> to vector<1x32x128xf32>
    tpu.vector_store %arg6[%c0_11, %c0_12, %c0_13], %32 {strides = array<i32>} : memref<2x32x128xf32, #tpu.memory_space<vmem>>, vector<1x32x128xf32>,
    %c1 = arith.constant 1 : index
    %c0_14 = arith.constant 0 : index
    %c0_15 = arith.constant 0 : index
    %33 = vector.load %arg6[%c1, %c0_14, %c0_15] : memref<2x32x128xf32, #tpu.memory_space<vmem>>, vector<1x32x128xf32>
    %34 = vector.shape_cast %33 : vector<1x32x128xf32> to vector<32x128xf32>
    %cst_16 = arith.constant 0.000000e+00 : f32
    %35 = vector.broadcast %cst_16 : f32 to vector<32x128xf32>
    %36 = arith.select %21, %16, %35 : vector<32x128xi1>, vector<32x128xf32>
    %37 = arith.addf %34, %36 : vector<32x128xf32>
    %c1_17 = arith.constant 1 : index
    %c0_18 = arith.constant 0 : index
    %c0_19 = arith.constant 0 : index
    %38 = vector.load %arg6[%c1_17, %c0_18, %c0_19] : memref<2x32x128xf32, #tpu.memory_space<vmem>>, vector<1x32x128xf32>
    %39 = vector.shape_cast %38 : vector<1x32x128xf32> to vector<32x128xf32>
    %40 = vector.shape_cast %37 : vector<32x128xf32> to vector<1x32x128xf32>
    tpu.vector_store %arg6[%c1_17, %c0_18, %c0_19], %40 {strides = array<i32>} : memref<2x32x128xf32, #tpu.memory_space<vmem>>, vector<1x32x128xf32>,
    %c1_i32_20 = arith.constant 1 : i32
    %c0_i32_21 = arith.constant 0 : i32
    %41 = arith.cmpi eq, %arg1, %c0_i32_21 : i32
    %42 = arith.extui %41 : i1 to i32
    %c0_i32_22 = arith.constant 0 : i32
    %43 = arith.cmpi ne, %42, %c0_i32_22 : i32
    scf.if %43 {
      %c0_23 = arith.constant 0 : index
      %c0_24 = arith.constant 0 : index
      %c0_25 = arith.constant 0 : index
      %44 = vector.load %arg6[%c0_23, %c0_24, %c0_25] : memref<2x32x128xf32, #tpu.memory_space<vmem>>, vector<2x32x128xf32>
      %c0_26 = arith.constant 0 : index
      %c0_27 = arith.constant 0 : index
      %c0_28 = arith.constant 0 : index
      %c0_29 = arith.constant 0 : index
      %45 = vector.load %arg5[%c0_26, %c0_27, %c0_28, %c0_29] : memref<1x2x32x128xf32, #tpu.memory_space<vmem>>, vector<1x2x32x128xf32>
      %46 = vector.shape_cast %45 : vector<1x2x32x128xf32> to vector<2x32x128xf32>
      %47 = vector.shape_cast %44 : vector<2x32x128xf32> to vector<1x2x32x128xf32>
      tpu.vector_store %arg5[%c0_26, %c0_27, %c0_28, %c0_29], %47 {strides = array<i32>} : memref<1x2x32x128xf32, #tpu.memory_space<vmem>>, vector<1x2x32x128xf32>,
    } else {
    }
    return
  }
  func.func @transform_0(%arg0: i32, %arg1: i32) -> (i32, i32) {
    %c1_i32 = arith.constant 1 : i32
    %0 = arith.muli %arg0, %c1_i32 : i32
    %1 = arith.addi %0, %arg1 : i32
    %c0_i32 = arith.constant 0 : i32
    %2 = arith.minsi %1, %c0_i32 : i32
    %c0_i32_0 = arith.constant 0 : i32
    %c0_i32_1 = arith.constant 0 : i32
    return %2, %c0_i32_0 : i32, i32
  }
  func.func @transform_1(%arg0: i32, %arg1: i32) -> (i32, i32) {
    %c1_i32 = arith.constant 1 : i32
    %0 = arith.muli %arg0, %c1_i32 : i32
    %1 = arith.addi %0, %arg1 : i32
    %c0_i32 = arith.constant 0 : i32
    %2 = arith.minsi %1, %c0_i32 : i32
    %c0_i32_0 = arith.constant 0 : i32
    %c0_i32_1 = arith.constant 0 : i32
    return %2, %c0_i32_0 : i32, i32
  }
  func.func @transform_2(%arg0: i32, %arg1: i32) -> (i32, i32) {
    %c1_i32 = arith.constant 1 : i32
    %0 = arith.muli %arg0, %c1_i32 : i32
    %1 = arith.addi %0, %arg1 : i32
    %c0_i32 = arith.constant 0 : i32
    %2 = arith.minsi %1, %c0_i32 : i32
    %c0_i32_0 = arith.constant 0 : i32
    %c0_i32_1 = arith.constant 0 : i32
    return %2, %c0_i32_0 : i32, i32
  }
  func.func @transform_3(%arg0: i32, %arg1: i32) -> (i32, i32, i32, i32) {
    %c0_i32 = arith.constant 0 : i32
    %c0_i32_0 = arith.constant 0 : i32
    %c0_i32_1 = arith.constant 0 : i32
    %c0_i32_2 = arith.constant 0 : i32
    return %arg0, %c0_i32, %c0_i32_0, %c0_i32_1 : i32, i32, i32, i32
  }
}

</mosaic_0001>

<bundles_post_ra>
// kernel: tpu_custom_call.1
= control target key start
LH: loop header
LB: loop body
LE: loop exit
PB: predicated region body
PF: predicated region fallthrough
CT: control target
= control target key end

     0   :  { %s1145_s0 = inlined_call_operand.hbm [shape: f32[32,128], index: 0, kind: input, shape index: {}]   ;;  %s1146_s1 = inlined_call_operand.hbm [shape: f32[32,128], index: 1, kind: input, shape index: {}]   ;;  %s1147_s2 = inlined_call_operand.hbm [shape: f32[32,128], index: 2, kind: input, shape index: {}]   ;;  %s1148_s3 = inlined_call_operand.hbm [shape: f32[2,2,32,128], index: 3, kind: output, shape index: {}]  }
   0x1   :  { %1152 = sst [smem:[#allocation14_spill]] %s1146_s1 }
   0x2   :  { %8 = vsyncpa [#allocation4], 0 }
   0x3   :  { %10 = vsyncpa [#allocation4 + $0x1], 0 }
   0x4   :  { %11 = vsyncpa [#allocation7], 0 }
   0x5   :  { %13 = vsyncpa [#allocation7 + $0x1], 0 }
   0x6   :  { %14 = vsyncpa [#allocation5], 0 }
   0x7   :  { %16 = vsyncpa [#allocation5 + $0x1], 0  ;;  %s921_s12 = smov 0   ;;  %s923_s13 = smov 0  }
   0x8   :  { %s925_s14 = smov 0   ;;  %s927_s15 = smov 0  }
   0x9   :  { %s929_s16 = smov 0   ;;  %s931_s17 = smov 0  }
   0xa   :  { %s933_s18 = smov 0   ;;  %s935_s19 = smov 0  }
   0xb LB: > { %s960_s20 = sadd.s32 4294967295, %s892_s19   ;;  %s568_s21 = sadd.s32 4294967294, %s892_s19   ;;  %s892_s19 = sphi %s935_s19, %s22_s19   ;;  %s888_s18 = sphi %s933_s18, %s1168_s18   ;;  %s884_s17 = sphi %s931_s17, %s1167_s17   ;;  %s880_s16 = sphi %s929_s16, %s1135_s16   ;;  %s876_s15 = sphi %s927_s15, %s1166_s15   ;;  %s872_s14 = sphi %s925_s14, %s1165_s14   ;;  %s868_s13 = sphi %s923_s13, %s1164_s13   ;;  %s864_s12 = sphi %s921_s12, %s1163_s12  }
   0xc   : > { %s34_s22 = sadd.s32 1, %s888_s18  ;;  %p861_p1 = scmp.ne.s32.totalorder %s880_s16, 0 }
   0xd   : > { %p36_p0 = scmp.ge.s32.totalorder %s34_s22, 2  ;;  %p55_p2 = scmp.eq.s32.totalorder %s892_s19, 0 }
   0xe   : > { %p60_p3 = scmp.ne.s32.totalorder %s880_s16, %s876_s15  ;;  %p61_p5 = scmp.eq.s32.totalorder %s960_s20, 0 }
   0xf   : > { %s1170_s22 = smov (%p36_p0, %s34_s22), 0  ;;  %p969_p4 = por %p861_p1, %p55_p2 }
  0x10   : > { %1153 = sst [smem:[#allocation13_spill]] %s1170_s22  ;;  %p974_p6 = por %p61_p5, %p60_p3 }
  0x11   : > { %s134_s25 = ssub.s32 %s888_s18, %s1170_s22  ;;  %s137_s26 = sadd.s32 1, %s872_s14 }
  0x12   : > { %p135_p7 = scmp.eq.s32.totalorder %s134_s25, 0  ;;  %p147_p8 = scmp.ne.s32.totalorder %s872_s14, %s868_s13 }
  0x13   : > { %p148_p9 = scmp.eq.s32.totalorder %s960_s20, 1  ;;  %p153_p10 = scmp.ne.s32.totalorder %s868_s13, %s864_s12 }
  0x14   : > { %s982_s27 = scalar_select %p135_p7, %s872_s14, %s137_s26  }
  0x15   : > { %p154_p11 = scmp.eq.s32.totalorder %s568_s21, 1  ;;  %p989_p12 = por %p148_p9, %p147_p8 }
  0x16   : > { %p570_p13 = scmp.ge.s32.totalorder %s892_s19, 2  ;;  %p617_p1 = scmp.lt.s32.totalorder %s892_s19, 2 }
  0x17   : > { %p994_p0 = por %p154_p11, %p153_p10  ;;  %s199_s4 = sand.u32 1, %s892_s19  }
  0x18   : > { %p1001_p2 = pnand %p617_p1, %p969_p4  ;;  %s894_s5 = smov [#allocation6]  }
  0x19   : > { %s214_s6 = sshll.u32 %s894_s5, 4  ;;  %s1159_s1 = sld [smem:[#allocation14_spill]]  ;;  %s215_s6 = int_to_ptr.vmem [resolvable:$true] %s214_s6 }
  0x1a   : > { %p580_p3 = scmp.ge.s32.totalorder %s892_s19, 1  ;;  %s1010_s10 = scalar_lea.sflag [#allocation7], %s199_s4 }
  0x1b   : > { %p699_p5 = pneg %p1001_p2 }
  0x1f   : > { %s212_s9 = sshll.u32 %s1159_s1, 4  ;;  %s702_s25 = scalar_lea.hbm %s1159_s1, 32  ;;  %s213_s9 = int_to_ptr.hbm [resolvable:$true] %s212_s9 }
  0x20   : > { %s695_s11 = sshra.s32 %s213_s9, 4  ;;  %s696_s11 = int_to_ptr.hbm [resolvable:$true] %s695_s11 }
  0x21   : > { %s697_s15 = scalar_lea.hbm %s696_s11, 32 }
  0x22   : > { %p698_p4 = scmp.ne.s32.totalorder %s696_s11, %s697_s15  ;;  %p704_p9 = scmp.lt.s32.totalorder %s702_s25, %s697_s15 }
  0x24   : > { %p700_p7 = pnand %p699_p5, %p698_p4 }
  0x26   : > { %p701_p8 = pneg %p700_p7 }
  0x28   : > { %p706_p10 = pnand %p704_p9, %p701_p8 }
  0x2a   : > { %709 = shalt.err (!%p706_p10)
}
  0x2b   : > { %s1149_s26 = smov 128   ;;  %s896_s4 = smov 8  }
  0x2c   : > { %609 = dma.hbm_to_vmem [thread:$0]  (!%p1001_p2), %s213_s9, 512, %s215_s6, %s1010_s10, %s1149_s26, %s1149_s26, %s896_s4  }
  0x2d   : > { %p247_p11 = scmp.lt.s32.totalorder %s892_s19, 3  ;;  %s897_s7 = smov [#allocation3]  }
  0x2e   : > { %s189_s8 = sshll.u32 %s897_s7, 4  ;;  %s187_s21 = sshll.u32 %s1145_s0, 4  ;;  %s190_s8 = int_to_ptr.vmem [resolvable:$true] %s189_s8  ;;  %s188_s21 = int_to_ptr.hbm [resolvable:$true] %s187_s21 }
  0x2f   : > { %p1029_p1 = pnand %p580_p3, %p247_p11  ;;  %s725_s23 = sshra.s32 %s188_s21, 4  ;;  %s726_s23 = int_to_ptr.hbm [resolvable:$true] %s725_s23 }
  0x30   : > { %s727_s25 = scalar_lea.hbm %s726_s23, 32  ;;  %s732_s26 = scalar_lea.hbm %s1145_s0, 32 }
  0x31   : > { %p728_p4 = scmp.ne.s32.totalorder %s726_s23, %s727_s25  ;;  %p734_p3 = scmp.lt.s32.totalorder %s732_s26, %s727_s25 }
  0x33   : > { %p730_p7 = pnand %p728_p4, %p699_p5 }
  0x35   : > { %p731_p8 = pneg %p730_p7 }
  0x37   : > { %p736_p9 = pnand %p734_p3, %p731_p8 }
  0x39   : > { %739 = shalt.err (!%p736_p9)
}
  0x3a   : > { %s1161_s7 = smov 128   ;;  %s898_s11 = smov [#allocation8]  }
  0x3b   : > { %606 = dma.hbm_to_vmem [thread:$0]  (!%p1001_p2), %s188_s21, 512, %s190_s8, [#allocation4], %s1161_s7, %s1161_s7, %s896_s4  }
  0x3c   : > { %s239_s15 = sshll.u32 %s898_s11, 4  ;;  %s237_s22 = sshll.u32 %s1147_s2, 4  ;;  %s240_s15 = int_to_ptr.vmem [resolvable:$true] %s239_s15  ;;  %s238_s22 = int_to_ptr.hbm [resolvable:$true] %s237_s22 }
  0x3d   : > { %s755_s6 = sshra.s32 %s238_s22, 4  ;;  %s762_s8 = scalar_lea.hbm %s1147_s2, 32  ;;  %s756_s6 = int_to_ptr.hbm [resolvable:$true] %s755_s6 }
  0x3e   : > { %s757_s26 = scalar_lea.hbm %s756_s6, 32 }
  0x3f   : > { %p758_p10 = scmp.ne.s32.totalorder %s756_s6, %s757_s26  ;;  %p764_p7 = scmp.lt.s32.totalorder %s762_s8, %s757_s26 }
  0x41   : > { %p760_p11 = pnand %p758_p10, %p699_p5 }
  0x43   : > { %p761_p4 = pneg %p760_p11 }
  0x45   : > { %p766_p8 = pnand %p764_p7, %p761_p4 }
  0x47   : > { %769 = shalt.err (!%p766_p8)
}
  0x48   : > { %612 = dma.hbm_to_vmem [thread:$0]  (!%p1001_p2), %s238_s22, 512, %s240_s15, %s1010_s10, %s1161_s7, %s1161_s7, %s896_s4  }
  0x49   : > { %251 = sbr.rel (%p1029_p1) target bundleno = 102 (0x66), region = 32  ;;  %s253_s1 = sand.u32 (!%p1029_p1), 1, %s880_s16  }
  0x4a   : > { %s581_s21 = sshll.u32 (!%p1029_p1), %s253_s1, 5  ;;  %s254_s11 = scalar_lea.sflag (!%p1029_p1), [#allocation4], %s253_s1 }
  0x4b   : > { %s1065_s23 = scalar_lea.vmem (!%p1029_p1), [#allocation3], %s581_s21 }
  0x4e   : > { %850 = dma.done.wait (%p974_p6), %s254_s11, 512  }
  0x4f   : > { %852 = vsyncadd (%p974_p6), %s254_s11, 4294966784  ;;  %s263_s30 = sand.u32 1, %s960_s20   ;;  %s1072_s22 = scalar_lea.vmem [#allocation6], %s581_s21 }
  0x50   : > { %s264_s6 = scalar_lea.sflag [#allocation7], %s263_s30 }
  0x51   : > { %854 = dma.done.wait (%p974_p6), %s264_s6, 1024  }
  0x52   : > { %856 = vsyncadd (%p974_p6), %s264_s6, 4294966272  ;;  %v337_v0 = vlaneseq  ;;  %s308_s10 = sand.u32 1, %s868_s13   ;;  %s585_s4 = sshll.u32 %s884_s17, 5  ;;  %v342_v10 = vld [vmem:[%s1065_s23] sm:$0xff]  ;;  %v343_v14 = vld [vmem:[%s1065_s23 + $0x8] sm:$0xff] }
  0x53   : > { %v354_v2 = vstv %s585_s4  ;;  %s1082_s20 = sshll.u32 %s308_s10, 6  ;;  %v346_v11 = vld [vmem:[%s1072_s22] sm:$0xff]  ;;  %s277_s24 = scalar_lea.vmem [#allocation8], %s581_s21  ;;  %v347_v15 = vld [vmem:[%s1072_s22 + $0x8] sm:$0xff]  ;;  %v344_v18 = vld [vmem:[%s1065_s23 + $0x10] sm:$0xff] }
  0x54   : > { %v338_v1 = vshrl.u32 %v337_v0, 7  ;;  %v350_v12 = vld [vmem:[%s277_s24] sm:$0xff]  ;;  %s594_s5 = sshll.u32 %s884_s17, 6  ;;  %v351_v16 = vld [vmem:[%s277_s24 + $0x8] sm:$0xff]  ;;  %v348_v19 = vld [vmem:[%s1072_s22 + $0x10] sm:$0xff]  ;;  %s310_s17 = scalar_lea.vmem [#allocation9], %s1082_s20 }
  0x55   : > { %v363_v13 = vmul.f32 %v350_v12, %v342_v10  ;;  %v364_v17 = vmul.f32 %v351_v16, %v343_v14  ;;  %v352_v20 = vld [vmem:[%s277_s24 + $0x10] sm:$0xff]  ;;  %v345_v25 = vld [vmem:[%s1065_s23 + $0x18] sm:$0xff]  ;;  %s439_s26 = scalar_lea.hbm %s1148_s3, %s594_s5  ;;  %s440_s25 = sshll.u32 %s310_s17, 4  ;;  %s441_s25 = int_to_ptr.vmem [resolvable:$true] %s440_s25 }
  0x56   : > { %v355_v3 = vadd.s32 %v354_v2, %v338_v1  ;;  %v339_v4 = vadd.s32 8, %v338_v1  ;;  %v340_v5 = vadd.s32 16, %v338_v1  ;;  %v341_v6 = vadd.s32 24, %v338_v1  ;;  %v349_v26 = vld [vmem:[%s1072_s22 + $0x18] sm:$0xff]  ;;  %s442_s9 = sshll.u32 %s439_s26, 4  ;;  %s428_s8 = scalar_lea.sflag [#allocation5], %s308_s10  ;;  %s443_s9 = int_to_ptr.hbm [resolvable:$true] %s442_s9 }
  0x57   : > { %v367_v23 = vsub.f32 %v363_v13, %v346_v11  ;;  %v365_v24 = vmul.f32 %v352_v20, %v344_v18  ;;  %v353_v27 = vld [vmem:[%s277_s24 + $0x18] sm:$0xff]  ;;  %v368_v29 = vsub.f32 %v364_v17, %v347_v15  ;;  %s799_s1 = sshra.s32 %s443_s9, 4  ;;  %s805_s30 = scalar_lea.hbm %s1148_s3, 128  ;;  %s800_s1 = int_to_ptr.hbm [resolvable:$true] %s799_s1 }
  0x58   : > { %vm359_vm0 = vcmp.lt.s32.totalorder %v355_v3, 1  ;;  %v356_v7 = vadd.s32 %v354_v2, %v339_v4  ;;  %v357_v8 = vadd.s32 %v354_v2, %v340_v5  ;;  %v358_v9 = vadd.s32 %v354_v2, %v341_v6  ;;  %s801_s21 = scalar_lea.hbm %s800_s1, 64  ;;  %p806_p1 = scmp.lt.s32.totalorder %s800_s1, %s1148_s3 }
  0x59   : > { %v396_v21 = vsel %vm359_vm0, %v350_v12, 0.0  ;;  %v366_v30 = vmul.f32 %v353_v27, %v345_v25  ;;  %v375_v32 = vmul.f32 %v367_v23, %v367_v23  ;;  %v369_v33 = vsub.f32 %v365_v24, %v348_v19  ;;  %p802_p6 = scmp.ne.s32.totalorder %s800_s1, %s801_s21  ;;  %p807_p3 = scmp.lt.s32.totalorder %s805_s30, %s801_s21 }
  0x5a   : > { %vm360_vm1 = vcmp.lt.s32.totalorder %v356_v7, 1  ;;  %vm361_vm2 = vcmp.lt.s32.totalorder %v357_v8, 1  ;;  %vm362_vm3 = vcmp.lt.s32.totalorder %v358_v9, 1  ;;  %423 = vst [vmem:[%s310_s17 + $0x20] sm:$0xff] %v396_v21  ;;  %v376_v34 = vmul.f32 %v368_v29, %v368_v29 }
  0x5b   : > { %v397_v22 = vsel %vm360_vm1, %v351_v16, 0.0  ;;  %v398_v28 = vsel %vm361_vm2, %v352_v20, 0.0  ;;  %v399_v31 = vsel %vm362_vm3, %v353_v27, 0.0  ;;  %v370_v35 = vsub.f32 %v366_v30, %v349_v26  ;;  %p803_p2 = pnand %p802_p6, %p989_p12  ;;  %p808_p9 = por %p807_p3, %p806_p1 }
  0x5c   : > { %424 = vst [vmem:[%s310_s17 + $0x28] sm:$0xff] %v397_v22  ;;  %v379_v36 = vsel %vm359_vm0, %v375_v32, 0.0  ;;  %v377_v37 = vmul.f32 %v369_v33, %v369_v33  ;;  %v380_v38 = vsel %vm360_vm1, %v376_v34, 0.0 }
  0x5d   : > { %425 = vst [vmem:[%s310_s17 + $0x30] sm:$0xff] %v398_v28  ;;  %v378_v39 = vmul.f32 %v370_v35, %v370_v35  ;;  %p804_p5 = pneg %p803_p2 }
  0x5e   : > { %426 = vst [vmem:[%s310_s17 + $0x38] sm:$0xff] %v399_v31  ;;  %v381_v40 = vsel %vm361_vm2, %v377_v37, 0.0 }
  0x5f   : > { %419 = vst [vmem:[%s310_s17] sm:$0xff] %v379_v36  ;;  %v382_v41 = vsel %vm362_vm3, %v378_v39, 0.0  ;;  %p809_p10 = pnand %p808_p9, %p804_p5 }
  0x60   : > { %420 = vst [vmem:[%s310_s17 + $0x8] sm:$0xff] %v380_v38 }
  0x61   : > { %421 = vst [vmem:[%s310_s17 + $0x10] sm:$0xff] %v381_v40 }
  0x62   : > { %422 = vst [vmem:[%s310_s17 + $0x18] sm:$0xff] %v382_v41 }
  0x63   : > { %812 = shalt.err (!%p809_p10)
}
  0x64   : > { %s899_s10 = smov 128   ;;  %s900_s4 = smov 8  }
  0x65   : > { %601 = dma.vmem_to_hbm [thread:$0]  (%p989_p12), %s441_s25, 1024, %s443_s9, %s428_s8, %s899_s10, %s899_s10, %s900_s4  }
  0x66 PF: > { %s457_s20 = sand.u32 1, %s864_s12   ;;  %p614_p11 = pnand %p570_p13, %p994_p0 }
  0x67   : > { %s458_s24 = scalar_lea.sflag [#allocation5], %s457_s20 }
  0x68   : > { %p615_p4 = pneg %p614_p11 }
  0x6a   : > { %858 = dma.done.wait (%p615_p4), %s458_s24, 1024  }
  0x6b   : > { %860 = vsyncadd (%p615_p4), %s458_s24, 4294966272  ;;  %s22_s19 = sadd.s32 1, %s892_s19   ;;  %s1162_s28 = sld [smem:[#allocation13_spill]] }
  0x6c   : > { %p19_p7 = scmp.ge.s32.totalorder %s22_s19, 4   ;;  %s1163_s12 = smov %s868_s13 }
  0x6d   : > { %s1164_s13 = smov %s872_s14  ;;  %s1165_s14 = smov %s982_s27 }
  0x6e   : > { %s1166_s15 = smov %s880_s16  ;;  %s1135_s16 = smov 0  }
  0x6f   : > { %s1167_s17 = smov %s888_s18  ;;  %21 = sbr.rel (!%p19_p7) target bundleno = 11 (0xb), region = 110 }
  0x71   : > { %s1168_s18 = smov %s1162_s28 }
  0x74   :  { %464 = vsyncpa [#allocation4], 1 }
  0x75   :  { %466 = vsyncpa [#allocation4 + $0x1], 1 }
  0x76   :  { %467 = vsyncpa [#allocation7], 1 }
  0x77   :  { %469 = vsyncpa [#allocation7 + $0x1], 1 }
  0x78   :  { %470 = vsyncpa [#allocation5], 1 }
  0x79   :  { %472 = vsyncpa [#allocation5 + $0x1], 1 }

</bundles_post_ra>
